<compile_context>
chip_gen: v6e
topology: v6e:2x2x1
jax: 0.10.0
libtpu: 0.0.40
codegen_flags: <defaults>
</compile_context>

<pallas_src>
import functools

import jax
import jax.numpy as jnp
from jax.experimental import pallas as pl
from jax.experimental.pallas import tpu as pltpu


_VMEM_CAP_BYTES = 48 * 1024 * 1024       # safe on v7x (64 MiB/TC) and v5e/v6e (128 MiB)
_STREAM_WEIGHT_BYTES = 40 * 1024 * 1024  # above this resident footprint, stream w_mid
_INTERNAL_FUDGE_BYTES = 2 * 1024 * 1024  # Mosaic internal scratch headroom


# ----------------------------------------------------------------------------
# Activation (mirrors the PyTorch Nonlinearity module).
# ----------------------------------------------------------------------------
def _apply_act(x, name):
    if name == "relu":
        return jnp.maximum(x, 0)
    if name == "sigmoid":
        return jax.nn.sigmoid(x)
    if name == "leaky_relu":
        return jnp.where(x >= 0, x, 0.01 * x)  # F.leaky_relu default slope
    if name == "sine":
        return jnp.sin(x)
    if name == "tanh":
        return jnp.tanh(x)
    raise ValueError(f"unsupported activation: {name}")


def _act_then_cast(h, name, adt, cdt):
    """Activation in `adt` (compute dtype by default; f32 override for v5e),
    result cast to the matmul operand dtype `cdt`."""
    a = _apply_act(h.astype(adt), name)
    return a if a.dtype == jnp.dtype(cdt) else a.astype(cdt)


def _round_up(n, m):
    return ((n + m - 1) // m) * m


# ----------------------------------------------------------------------------
# Kernels.
# ----------------------------------------------------------------------------
def _net_kernel_mid(x_ref, wf_ref, wm_ref, wl_ref, o_ref, *, act, num_mid, cdt, adt):
    """Fully-resident weights; the middle-layer loop is unrolled at trace time.
    NOTE: for large tile_b*W the compiler materializes h in VMEM -- this is
    accounted for in the wrapper's VMEM budget."""
    h = jnp.dot(x_ref[...].astype(cdt), wf_ref[...], preferred_element_type=jnp.float32)
    for l in range(num_mid):  # static unroll; wm_ref[l] is a static index
        a = _act_then_cast(h, act, adt, cdt)
        h = jnp.dot(a, wm_ref[l], preferred_element_type=jnp.float32)
    a = _act_then_cast(h, act, adt, cdt)
    o_ref[...] = jnp.dot(a, wl_ref[...], preferred_element_type=jnp.float32).astype(o_ref.dtype)


def _net_kernel_nomid(x_ref, wf_ref, wl_ref, o_ref, *, act, cdt, adt):
    """depth == 1: no middle layers (avoids a zero-extent operand)."""
    h = jnp.dot(x_ref[...].astype(cdt), wf_ref[...], preferred_element_type=jnp.float32)
    a = _act_then_cast(h, act, adt, cdt)
    o_ref[...] = jnp.dot(a, wl_ref[...], preferred_element_type=jnp.float32).astype(o_ref.dtype)


def _net_kernel_streamed(x_ref, wf_ref, wm_ref, wl_ref, o_ref, h_ref, *, act, cdt, adt):
    """Streamed w_mid: grid = (batch_tiles, L); one middle layer per step.
    The running activation lives in a VMEM scratch accumulator (f32)."""
    l = pl.program_id(1)

    @pl.when(l == 0)
    def _():
        h_ref[...] = jnp.dot(x_ref[...].astype(cdt), wf_ref[...],
                             preferred_element_type=jnp.float32)

    a = _act_then_cast(h_ref[...], act, adt, cdt)
    h_ref[...] = jnp.dot(a, wm_ref[0], preferred_element_type=jnp.float32)

    @pl.when(l == pl.num_programs(1) - 1)
    def _():
        a_last = _act_then_cast(h_ref[...], act, adt, cdt)
        o_ref[...] = jnp.dot(a_last, wl_ref[...],
                             preferred_element_type=jnp.float32).astype(o_ref.dtype)


# ----------------------------------------------------------------------------
# Spec / sizing helpers.
# ----------------------------------------------------------------------------
def _resident_spec(block_shape, index_map):
    """BlockSpec for a grid-invariant (weight) operand: single-buffered.
    Weights never change across grid steps, so double-buffering them is pure
    VMEM waste. Falls back to a plain BlockSpec on JAX versions without
    pipeline_mode support."""
    try:
        return pl.BlockSpec(block_shape, index_map, pipeline_mode=pl.Buffered(1))
    except Exception:  # pragma: no cover - older JAX without pipeline_mode
        return pl.BlockSpec(block_shape, index_map)


def _pick_tile_b(B, per_row_bytes, fixed_bytes, budget, tile_b_max):
    """Largest batch tile that fits the VMEM budget.
    Prefers >= 2 grid steps once B >= 16 (keeps both v7x TensorCores busy) and
    rounds to a multiple of 256 when >= 256 (v6e/v7x MXU is 256-wide)."""
    B8 = _round_up(max(B, 1), 8)
    if B8 <= 8:
        upper = 8
    else:
        upper = min(tile_b_max, _round_up((B8 + 1) // 2, 8))
    upper = max(upper, 8)
    tile_b = (upper // 256) * 256 if upper >= 256 else upper
    while tile_b > 256 and fixed_bytes + tile_b * per_row_bytes > budget:
        tile_b -= 256
    while tile_b > 8 and fixed_bytes + tile_b * per_row_bytes > budget:
        tile_b -= 8
    return tile_b


# ----------------------------------------------------------------------------
# One-time parameter prep (hoisted out of the per-call path).
# ----------------------------------------------------------------------------
def prepare_net_params(w_first, w_mid, w_last, *, compute_dtype=jnp.bfloat16):
    """Cast weights to compute_dtype and zero-pad w_last's columns to a
    lane-dense multiple of 128. Call once; reuse the result every forward."""
    C = w_last.shape[1]
    C_pad = _round_up(C, 128)
    wl = jnp.pad(w_last, ((0, 0), (0, C_pad - C))) if C_pad != C else w_last
    no_mid = w_mid is None or w_mid.shape[0] == 0
    return {
        "w_first": w_first.astype(compute_dtype),
        "w_mid": None if no_mid else w_mid.astype(compute_dtype),
        "w_last": wl.astype(compute_dtype),
        "num_classes": C,
        "compute_dtype": jnp.dtype(compute_dtype),
    }


# ----------------------------------------------------------------------------
# Forward wrapper.
# ----------------------------------------------------------------------------
def net_forward_pallas(
    x,
    params,
    *,
    act_name="relu",
    out_dtype=None,       # default: compute_dtype (halves output HBM writeback)
    act_dtype=None,        # default: compute_dtype (pass jnp.float32 on v5e)
    tile_b_max=512,        # raise to 1024 on v5e/v6e if VMEM allows
    force_stream=False,    # force the streamed-w_mid path (testing / huge nets)
):
    """x: [B, dim]; params from prepare_net_params(). Returns [B, num_classes]."""
    wf, wm, wl = params["w_first"], params["w_mid"], params["w_last"]
    C = params["num_classes"]
    cdt = params["compute_dtype"]
    adt = jnp.dtype(cdt if act_dtype is None else act_dtype)
    out_dtype = jnp.dtype(cdt if out_dtype is None else out_dtype)

    B, dim = x.shape
    W = wf.shape[1]
    L = 0 if wm is None else wm.shape[0]
    C_pad = wl.shape[1]

    itemsize = jnp.dtype(cdt).itemsize
    x_itemsize = jnp.dtype(x.dtype).itemsize
    o_itemsize = jnp.dtype(out_dtype).itemsize

    # --- resident vs streamed weight policy ---------------------------------
    resident_w_bytes = (dim * W + L * W * W + W * C_pad) * itemsize
    use_streamed = L > 0 and (force_stream or resident_w_bytes > _STREAM_WEIGHT_BYTES)

    if use_streamed:
        # wf + wl single-buffered, one (double-buffered) w_mid layer at a time.
        fixed_w_bytes = (dim * W + W * C_pad) * itemsize + 2 * W * W * itemsize
        per_row_scratch = W * 4  # persistent h accumulator (f32)
    else:
        fixed_w_bytes = resident_w_bytes  # single-buffered (pl.Buffered(1))
        per_row_scratch = 0

    # Per-batch-row VMEM: x tile (2 bufs) + out tile (2 bufs) + live h/a activations.
    per_row_bytes = (2 * dim * x_itemsize + 2 * C_pad * o_itemsize
                     + 2 * W * (4 + itemsize) + per_row_scratch)
    fixed_bytes = fixed_w_bytes + _INTERNAL_FUDGE_BYTES

    tile_b = _pick_tile_b(B, per_row_bytes, fixed_bytes, _VMEM_CAP_BYTES, tile_b_max)
    nb = pl.cdiv(B, tile_b)

    vmem_needed = fixed_bytes + tile_b * per_row_bytes
    vmem_limit = int(min(_VMEM_CAP_BYTES, max(vmem_needed, 32 * 1024 * 1024)))

    # --- cost estimate --------------------------------------------------------
    flops = 2 * B * (dim * W + L * W * W + W * C_pad)
    trans = B * W * (L + 1) if act_name in ("sigmoid", "tanh", "sine") else 0
    bytes_accessed = (B * dim * x_itemsize + fixed_w_bytes + B * C_pad * o_itemsize)
    cost = pl.CostEstimate(flops=flops, transcendentals=trans,
                           bytes_accessed=bytes_accessed)

    # --- grid / specs ---------------------------------------------------------
    if use_streamed:
        grid = (nb, L)
        in_specs = [
            pl.BlockSpec((tile_b, dim), lambda i, l: (i, 0)),        # refetched only when i changes
            _resident_spec((dim, W), lambda i, l: (0, 0)),
            pl.BlockSpec((1, W, W), lambda i, l: (l, 0, 0)),          # streamed, double-buffered
            _resident_spec((W, C_pad), lambda i, l: (0, 0)),
        ]
        out_specs = pl.BlockSpec((tile_b, C_pad), lambda i, l: (i, 0))
        scratch = [pltpu.VMEM((tile_b, W), jnp.float32)]
        operands = (x, wf, wm, wl)
        kernel = functools.partial(_net_kernel_streamed, act=act_name, cdt=cdt, adt=adt)
        semantics = ("parallel", "arbitrary")
    else:
        grid = (nb,)
        in_specs = [pl.BlockSpec((tile_b, dim), lambda i: (i, 0)),
                    _resident_spec((dim, W), lambda i: (0, 0))]
        operands = [x, wf]
        if L > 0:
            in_specs.append(_resident_spec((L, W, W), lambda i: (0, 0, 0)))
            operands.append(wm)
        in_specs.append(_resident_spec((W, C_pad), lambda i: (0, 0)))
        operands.append(wl)
        out_specs = pl.BlockSpec((tile_b, C_pad), lambda i: (i, 0))
        scratch = []
        if L > 0:
            kernel = functools.partial(_net_kernel_mid, act=act_name, num_mid=L,
                                       cdt=cdt, adt=adt)
        else:
            kernel = functools.partial(_net_kernel_nomid, act=act_name, cdt=cdt, adt=adt)
        semantics = ("parallel",)

    out_pad = pl.pallas_call(
        kernel,
        out_shape=jax.ShapeDtypeStruct((B, C_pad), out_dtype),
        grid=grid,
        in_specs=in_specs,
        out_specs=out_specs,
        scratch_shapes=scratch,
        compiler_params=pltpu.CompilerParams(
            dimension_semantics=semantics,
            vmem_limit_bytes=vmem_limit,
        ),
        cost_estimate=cost,
    )(*operands)

    return out_pad[:, :C]


# ----------------------------------------------------------------------------
# Pure-JAX reference mirroring Net.forward.
# ----------------------------------------------------------------------------
def net_forward_ref(x, w_first, w_mid, w_last, *, act_name="relu"):
    h = x @ w_first
    if w_mid is not None:
        for l in range(w_mid.shape[0]):
            h = _apply_act(h, act_name) @ w_mid[l]
    return _apply_act(h, act_name) @ w_last


# ----------------------------------------------------------------------------
# Self-test.
# ----------------------------------------------------------------------------
if __name__ == "__main__":
    key = jax.random.PRNGKey(0)

    def make_params(k, dim, depth, width, num_classes):
        kf, km, kl = jax.random.split(k, 3)
        w_first = jax.random.normal(kf, (dim, width), jnp.float32) * (1.0 / dim**0.5)
        if depth > 1:
            w_mid = jax.random.normal(km, (depth - 1, width, width), jnp.float32) * (1.0 / width**0.5)
        else:
            w_mid = None
        w_last = jax.random.normal(kl, (width, num_classes), jnp.float32) * (1.0 / width**0.5)
        return w_first, w_mid, w_last

    # (B, dim, depth, width, num_classes, act, compute_dtype, force_stream, tol)
    cases = [
        (8,   32, 3, 128, 2, "relu",       jnp.float32,  False, 2e-4),  # resident, base
        (8,   32, 1, 128, 2, "tanh",       jnp.float32,  False, 2e-4),  # depth==1 branch
        (260, 32, 3, 128, 2, "sigmoid",    jnp.float32,  False, 2e-4),  # partial last batch tile
        (16,  32, 4, 128, 2, "leaky_relu", jnp.bfloat16, False, 6e-2),  # default bf16 path, 2-tile grid
        (16,  32, 3, 128, 2, "sine",       jnp.float32,  True,  2e-4),  # streamed-w_mid path
    ]

    for (B, dim, depth, W, C, act, cdt, stream, tol) in cases:
        kx, kp, key = jax.random.split(key, 3)
        x = jax.random.normal(kx, (B, dim), dtype=jnp.float32)
        w_first, w_mid, w_last = make_params(kp, dim, depth, W, C)

        # One-time weight prep (hoisted out of the per-call path).
        params = prepare_net_params(w_first, w_mid, w_last, compute_dtype=cdt)

        out = net_forward_pallas(x, params, act_name=act, force_stream=stream)
        out = jax.block_until_ready(out)

        ref = net_forward_ref(x, w_first, w_mid, w_last, act_name=act)
        assert out.shape == (B, C), f"bad shape {out.shape} (expected {(B, C)})"
        err = float(jnp.max(jnp.abs(out.astype(jnp.float32) - ref)))
        assert jnp.allclose(out.astype(jnp.float32), ref, atol=tol, rtol=tol), (
            f"mismatch vs reference for case "
            f"(B={B}, depth={depth}, act={act}, dtype={cdt}, stream={stream}); "
            f"max abs err = {err}"
        )

    print("KERNEL_OK")
</pallas_src>

<mosaic_0001>
module attributes {stable_mosaic.version = 11 : i64} {
  func.func @_net_kernel_mid(%arg0: i32, %arg1: memref<8x32xf32, #tpu.memory_space<vmem>>, %arg2: memref<32x128xf32, #tpu.memory_space<vmem>>, %arg3: memref<2x128x128xf32, #tpu.memory_space<vmem>>, %arg4: memref<128x128xf32, #tpu.memory_space<vmem>>, %arg5: memref<8x128xf32, #tpu.memory_space<vmem>>) attributes {dimension_semantics = [#tpu.dimension_semantics<parallel>], iteration_bounds = array<i64: 1>, scalar_prefetch = 0 : i64, scratch_operands = 0 : i64, tpu.core_type = #tpu.core_type<tc>, window_params = [{transform_indices = @transform_0, window_bounds = array<i64: 8, 32>}, {pipeline_mode = #tpu.pipeline_mode<synchronous>, transform_indices = @transform_1, window_bounds = array<i64: 32, 128>}, {pipeline_mode = #tpu.pipeline_mode<synchronous>, transform_indices = @transform_2, window_bounds = array<i64: 2, 128, 128>}, {pipeline_mode = #tpu.pipeline_mode<synchronous>, transform_indices = @transform_3, window_bounds = array<i64: 128, 128>}, {transform_indices = @transform_4, window_bounds = array<i64: 8, 128>}]} {
    %c0 = arith.constant 0 : index
    %c0_0 = arith.constant 0 : index
    %0 = vector.load %arg1[%c0, %c0_0] : memref<8x32xf32, #tpu.memory_space<vmem>>, vector<8x32xf32>
    %c0_1 = arith.constant 0 : index
    %c0_2 = arith.constant 0 : index
    %1 = vector.load %arg2[%c0_1, %c0_2] : memref<32x128xf32, #tpu.memory_space<vmem>>, vector<32x128xf32>
    %cst = arith.constant dense<0.000000e+00> : vector<8x128xf32>
    %2 = tpu.matmul %0, %1, %cst {dimension_numbers = #tpu.dot_dimension_numbers<[1], [0], [0], [1], [0, 0, 1, 1], [], []>} : vector<8x32xf32>, vector<32x128xf32>, vector<8x128xf32> -> vector<8x128xf32>
    %cst_3 = arith.constant 0.000000e+00 : f32
    %3 = vector.broadcast %cst_3 : f32 to vector<8x128xf32>
    %4 = arith.maximumf %2, %3 : vector<8x128xf32>
    %c0_4 = arith.constant 0 : index
    %c0_5 = arith.constant 0 : index
    %c0_6 = arith.constant 0 : index
    %5 = vector.load %arg3[%c0_4, %c0_5, %c0_6] : memref<2x128x128xf32, #tpu.memory_space<vmem>>, vector<1x128x128xf32>
    %6 = vector.shape_cast %5 : vector<1x128x128xf32> to vector<128x128xf32>
    %cst_7 = arith.constant dense<0.000000e+00> : vector<8x128xf32>
    %7 = tpu.matmul %4, %6, %cst_7 {dimension_numbers = #tpu.dot_dimension_numbers<[1], [0], [0], [1], [0, 0, 1, 1], [], []>} : vector<8x128xf32>, vector<128x128xf32>, vector<8x128xf32> -> vector<8x128xf32>
    %cst_8 = arith.constant 0.000000e+00 : f32
    %8 = vector.broadcast %cst_8 : f32 to vector<8x128xf32>
    %9 = arith.maximumf %7, %8 : vector<8x128xf32>
    %c1 = arith.constant 1 : index
    %c0_9 = arith.constant 0 : index
    %c0_10 = arith.constant 0 : index
    %10 = vector.load %arg3[%c1, %c0_9, %c0_10] : memref<2x128x128xf32, #tpu.memory_space<vmem>>, vector<1x128x128xf32>
    %11 = vector.shape_cast %10 : vector<1x128x128xf32> to vector<128x128xf32>
    %cst_11 = arith.constant dense<0.000000e+00> : vector<8x128xf32>
    %12 = tpu.matmul %9, %11, %cst_11 {dimension_numbers = #tpu.dot_dimension_numbers<[1], [0], [0], [1], [0, 0, 1, 1], [], []>} : vector<8x128xf32>, vector<128x128xf32>, vector<8x128xf32> -> vector<8x128xf32>
    %cst_12 = arith.constant 0.000000e+00 : f32
    %13 = vector.broadcast %cst_12 : f32 to vector<8x128xf32>
    %14 = arith.maximumf %12, %13 : vector<8x128xf32>
    %c0_13 = arith.constant 0 : index
    %c0_14 = arith.constant 0 : index
    %15 = vector.load %arg4[%c0_13, %c0_14] : memref<128x128xf32, #tpu.memory_space<vmem>>, vector<128x128xf32>
    %cst_15 = arith.constant dense<0.000000e+00> : vector<8x128xf32>
    %16 = tpu.matmul %14, %15, %cst_15 {dimension_numbers = #tpu.dot_dimension_numbers<[1], [0], [0], [1], [0, 0, 1, 1], [], []>} : vector<8x128xf32>, vector<128x128xf32>, vector<8x128xf32> -> vector<8x128xf32>
    %c0_16 = arith.constant 0 : index
    %c0_17 = arith.constant 0 : index
    %17 = vector.load %arg5[%c0_16, %c0_17] : memref<8x128xf32, #tpu.memory_space<vmem>>, vector<8x128xf32>
    tpu.vector_store %arg5[%c0_16, %c0_17], %16 {strides = array<i32>} : memref<8x128xf32, #tpu.memory_space<vmem>>, vector<8x128xf32>,
    return
  }
  func.func @transform_0(%arg0: i32) -> (i32, i32) {
    %c0_i32 = arith.constant 0 : i32
    %c0_i32_0 = arith.constant 0 : i32
    return %arg0, %c0_i32 : i32, i32
  }
  func.func @transform_1(%arg0: i32) -> (i32, i32) {
    %c0_i32 = arith.constant 0 : i32
    %c0_i32_0 = arith.constant 0 : i32
    %c0_i32_1 = arith.constant 0 : i32
    return %c0_i32, %c0_i32_0 : i32, i32
  }
  func.func @transform_2(%arg0: i32) -> (i32, i32, i32) {
    %c0_i32 = arith.constant 0 : i32
    %c0_i32_0 = arith.constant 0 : i32
    %c0_i32_1 = arith.constant 0 : i32
    %c0_i32_2 = arith.constant 0 : i32
    return %c0_i32, %c0_i32_0, %c0_i32_1 : i32, i32, i32
  }
  func.func @transform_3(%arg0: i32) -> (i32, i32) {
    %c0_i32 = arith.constant 0 : i32
    %c0_i32_0 = arith.constant 0 : i32
    %c0_i32_1 = arith.constant 0 : i32
    return %c0_i32, %c0_i32_0 : i32, i32
  }
  func.func @transform_4(%arg0: i32) -> (i32, i32) {
    %c0_i32 = arith.constant 0 : i32
    %c0_i32_0 = arith.constant 0 : i32
    return %arg0, %c0_i32 : i32, i32
  }
}

</mosaic_0001>

<bundles_post_ra>
// kernel: tpu_custom_call.1
= control target key start
LH: loop header
LB: loop body
LE: loop exit
PB: predicated region body
PF: predicated region fallthrough
CT: control target
= control target key end

     0   :  { %9 = vsyncpa [#allocation3], 0  ;;  %s838_s0 = inlined_call_operand.hbm [shape: f32[8,32], index: 0, kind: input, shape index: {}]   ;;  %s839_s1 = inlined_call_operand.hbm [shape: f32[32,128], index: 1, kind: input, shape index: {}]   ;;  %s840_s2 = inlined_call_operand.hbm [shape: f32[2,128,128], index: 2, kind: input, shape index: {}]   ;;  %s841_s3 = inlined_call_operand.hbm [shape: f32[128,128], index: 3, kind: input, shape index: {}]   ;;  %s842_s4 = inlined_call_operand.hbm [shape: f32[8,128], index: 4, kind: output, shape index: {}]  }
   0x1   :  { %10 = vsyncpa [#allocation6], 0 }
   0x2   :  { %11 = vsyncpa [#allocation9], 0 }
   0x3   :  { %12 = vsyncpa [#allocation4], 0  ;;  %s720_s15 = smov [#allocation5]  }
   0x4   :  { %s28_s16 = sshll.u32 %s720_s15, 4  ;;  %s29_s16 = int_to_ptr.vmem [resolvable:$true] %s28_s16 }
   0x5   :  { %s620_s17 = scalar_lea.vmem %s29_s16, 512  ;;  %p625_p1 = scmp.lt.s32.totalorder %s29_s16, %s29_s16 }
   0x6   :  { %p621_p0 = scmp.ne.s32.totalorder %s29_s16, %s620_s17  ;;  %p626_p2 = scmp.lt.s32.totalorder %s620_s17, %s620_s17 }
   0x8   :  { %p627_p3 = por %p626_p2, %p625_p1 }
   0xa   :  { %p628_p4 = pnand %p627_p3, %p621_p0 }
   0xc   :  { %631 = shalt.err (!%p628_p4)
}
   0xd   :  { %s721_s18 = smov 128   ;;  %s722_s19 = smov 8  }
   0xe   :  { %34 = dma.hbm_to_vmem [thread:$0]  %s839_s1, 512, %s29_s16, [#allocation6], %s721_s18, %s721_s18, %s722_s19  }
   0xf   :  { %s723_s22 = smov [#allocation2]   ;;  %s724_s24 = smov [#allocation7]  }
  0x10   :  { %s19_s23 = sshll.u32 %s723_s22, 4  ;;  %s40_s25 = sshll.u32 %s724_s24, 4  ;;  %s20_s23 = int_to_ptr.vmem [resolvable:$true] %s19_s23  ;;  %s41_s25 = int_to_ptr.vmem [resolvable:$true] %s40_s25 }
  0x11   :  { %s640_s26 = scalar_lea.vmem %s20_s23, 128  ;;  %p645_p6 = scmp.lt.s32.totalorder %s20_s23, %s20_s23 }
  0x12   :  { %p641_p5 = scmp.ne.s32.totalorder %s20_s23, %s640_s26  ;;  %p646_p7 = scmp.lt.s32.totalorder %s640_s26, %s640_s26 }
  0x14   :  { %p647_p8 = por %p646_p7, %p645_p6 }
  0x16   :  { %p648_p9 = pnand %p647_p8, %p641_p5 }
  0x18   :  { %651 = shalt.err (!%p648_p9)
}
  0x19   :  { %22 = dma.hbm_to_vmem [thread:$0]  %s838_s0, 128, %s20_s23, [#allocation3]  }
  0x1a   :  { %s660_s29 = scalar_lea.vmem %s41_s25, 4096  ;;  %p665_p11 = scmp.lt.s32.totalorder %s41_s25, %s41_s25 }
  0x1b   :  { %p661_p10 = scmp.ne.s32.totalorder %s41_s25, %s660_s29  ;;  %p666_p12 = scmp.lt.s32.totalorder %s660_s29, %s660_s29 }
  0x1d   :  { %p667_p13 = por %p666_p12, %p665_p11 }
  0x1f   :  { %p668_p0 = pnand %p667_p13, %p661_p10 }
  0x21   :  { %671 = shalt.err (!%p668_p0)
}
  0x22   :  { %46 = dma.hbm_to_vmem [thread:$0]  %s840_s2, 4096, %s41_s25, [#allocation6], %s721_s18, %s721_s18, %s722_s19  }
  0x23   :  { %s725_s5 = smov [#allocation8]  }
  0x24   :  { %s52_s6 = sshll.u32 %s725_s5, 4  ;;  %s53_s6 = int_to_ptr.vmem [resolvable:$true] %s52_s6 }
  0x25   :  { %s680_s7 = scalar_lea.vmem %s53_s6, 2048  ;;  %p685_p2 = scmp.lt.s32.totalorder %s53_s6, %s53_s6 }
  0x26   :  { %p681_p1 = scmp.ne.s32.totalorder %s53_s6, %s680_s7  ;;  %p686_p3 = scmp.lt.s32.totalorder %s680_s7, %s680_s7 }
  0x28   :  { %p687_p4 = por %p686_p3, %p685_p2 }
  0x2a   :  { %p688_p5 = pnand %p687_p4, %p681_p1 }
  0x2c   :  { %691 = shalt.err (!%p688_p5)
}
  0x2d   :  { %58 = dma.hbm_to_vmem [thread:$0]  %s841_s3, 2048, %s53_s6, [#allocation9], %s721_s18, %s721_s18, %s722_s19  }
  0x2e   :  { %712 = dma.done.wait [#allocation3], 128  }
  0x2f   :  { %713 = vsyncadd [#allocation3], 4294967168 }
  0x30   :  { %714 = dma.done.wait [#allocation6], 4608  }
  0x31   :  { %715 = vsyncadd [#allocation6], 4294962688 }
  0x32   :  { %716 = dma.done.wait [#allocation9], 2048  }
  0x33   :  { %717 = vsyncadd [#allocation9], 4294965248  ;;  %v726_v0 = vmov 0.0   ;;  %vm727_vm0 = vmmov 0   ;;  %v75_v1 = vld [vmem:[#allocation5 + $0x18] sm:$0xff]  ;;  %v74_v2 = vld [vmem:[#allocation5 + $0x10] sm:$0xff] }
  0x34   :  { %487 = vmatprep.subr.mxu0 %v726_v0  ;;  %495 = vmatprep.mubr.msk.f32.mxu0 %vm727_vm0, %v726_v0  ;;  %v166_v3 = vld [vmem:[#allocation7 + $0x78] sm:$0xff]  ;;  %v73_v4 = vld [vmem:[#allocation5 + $0x8] sm:$0xff]  ;;  %v165_v5 = vld [vmem:[#allocation7 + $0x70] sm:$0xff]  ;;  %vm76_vm1 = vcmask 261120   ;;  %s728_s2 = smov [#allocation10]  }
  0x35   :  { %498 = vmatprep.subr.mxu1 %v726_v0  ;;  %530 = vmatprep.mubr.msk.f32.mxu1 %vm727_vm0, %v726_v0  ;;  %v164_v6 = vld [vmem:[#allocation7 + $0x68] sm:$0xff]  ;;  %v72_v7 = vld [vmem:[#allocation5] sm:$0xff]  ;;  %v71_v8 = vld [vmem:[#allocation2] sm:$0xff]  ;;  %s419_s3 = sshll.u32 %s728_s2, 4  ;;  %s420_s3 = int_to_ptr.vmem [resolvable:$true] %s419_s3 }
  0x36   :  { %488 = vmatpush3.msra.mxu0 %v75_v1  ;;  %499 = vmatpush3.msra.mxu1 %v166_v3  ;;  %v163_v9 = vld [vmem:[#allocation7 + $0x60] sm:$0xff]  ;;  %v162_v10 = vld [vmem:[#allocation7 + $0x58] sm:$0xff]  ;;  %v161_v11 = vld [vmem:[#allocation7 + $0x50] sm:$0xff]  ;;  %s692_s9 = scalar_lea.vmem %s420_s3, 128  ;;  %p697_p7 = scmp.lt.s32.totalorder %s420_s3, %s420_s3 }
  0x37   :  { %489 = vmatprep.subr.mxu0 %v726_v0  ;;  %500 = vmatprep.subr.mxu1 %v726_v0  ;;  %v160_v12 = vld [vmem:[#allocation7 + $0x48] sm:$0xff]  ;;  %v159_v13 = vld [vmem:[#allocation7 + $0x40] sm:$0xff]  ;;  %v158_v14 = vld [vmem:[#allocation7 + $0x38] sm:$0xff]  ;;  %p693_p6 = scmp.ne.s32.totalorder %s420_s3, %s692_s9  ;;  %p698_p8 = scmp.lt.s32.totalorder %s692_s9, %s692_s9 }
  0x38   :  { %490 = vmatpush3.msra.mxu0 %v74_v2  ;;  %501 = vmatpush3.msra.mxu1 %v165_v5  ;;  %v157_v15 = vld [vmem:[#allocation7 + $0x30] sm:$0xff]  ;;  %v156_v16 = vld [vmem:[#allocation7 + $0x28] sm:$0xff]  ;;  %v155_v17 = vld [vmem:[#allocation7 + $0x20] sm:$0xff] }
  0x39   :  { %491 = vmatprep.subr.mxu0 %v726_v0  ;;  %502 = vmatprep.subr.mxu1 %v726_v0  ;;  %v154_v18 = vld [vmem:[#allocation7 + $0x18] sm:$0xff]  ;;  %v153_v19 = vld [vmem:[#allocation7 + $0x10] sm:$0xff]  ;;  %v152_v20 = vld [vmem:[#allocation7 + $0x8] sm:$0xff]  ;;  %p699_p9 = por %p698_p8, %p697_p7 }
  0x3a   :  { %492 = vmatpush3.msra.mxu0 %v73_v4  ;;  %503 = vmatpush3.msra.mxu1 %v164_v6  ;;  %v151_v21 = vld [vmem:[#allocation7] sm:$0xff]  ;;  %v254_v22 = vld [vmem:[#allocation7 + $0xf8] sm:$0xff]  ;;  %v253_v23 = vld [vmem:[#allocation7 + $0xf0] sm:$0xff] }
  0x3b   :  { %493 = vmatprep.subr.mxu0 %v726_v0  ;;  %504 = vmatprep.subr.mxu1 %v726_v0  ;;  %v252_v24 = vld [vmem:[#allocation7 + $0xe8] sm:$0xff]  ;;  %v251_v25 = vld [vmem:[#allocation7 + $0xe0] sm:$0xff]  ;;  %v250_v26 = vld [vmem:[#allocation7 + $0xd8] sm:$0xff]  ;;  %p700_p10 = pnand %p699_p9, %p693_p6 }
  0x3c   :  { %494 = vmatpush3.msra.mxu0 %v72_v7  ;;  %505 = vmatpush3.msra.mxu1 %v163_v9  ;;  %v249_v27 = vld [vmem:[#allocation7 + $0xd0] sm:$0xff]  ;;  %v248_v28 = vld [vmem:[#allocation7 + $0xc8] sm:$0xff]  ;;  %v247_v29 = vld [vmem:[#allocation7 + $0xc0] sm:$0xff] }
  0x3d   :  { %496 = vmatmul.mubr.msk.f32.vlgmr.msra.gmra.mxu0 %vm76_vm1, %v71_v8  ;;  %506 = vmatprep.subr.mxu1 %v726_v0  ;;  %v246_v30 = vld [vmem:[#allocation7 + $0xb8] sm:$0xff]  ;;  %v245_v31 = vld [vmem:[#allocation7 + $0xb0] sm:$0xff]  ;;  %v244_v32 = vld [vmem:[#allocation7 + $0xa8] sm:$0xff] }
  0x3e   :  { %533 = vmatprep.subr.mxu0 %v726_v0  ;;  %507 = vmatpush3.msra.mxu1 %v162_v10  ;;  %v243_v33 = vld [vmem:[#allocation7 + $0xa0] sm:$0xff]  ;;  %v242_v34 = vld [vmem:[#allocation7 + $0x98] sm:$0xff]  ;;  %v241_v35 = vld [vmem:[#allocation7 + $0x90] sm:$0xff] }
  0x3f   :  { %565 = vmatprep.mubr.msk.f32.mxu0 %vm727_vm0, %v726_v0  ;;  %508 = vmatprep.subr.mxu1 %v726_v0  ;;  %v240_v39 = vld [vmem:[#allocation7 + $0x88] sm:$0xff]  ;;  %v239_v40 = vld [vmem:[#allocation7 + $0x80] sm:$0xff]  ;;  %v341_v41 = vld [vmem:[#allocation8 + $0x78] sm:$0xff] }
  0x40   :  { %509 = vmatpush3.msra.mxu1 %v161_v11  ;;  %534 = vmatpush3.msra.mxu0 %v254_v22  ;;  %v340_v42 = vld [vmem:[#allocation8 + $0x70] sm:$0xff]  ;;  %v339_v43 = vld [vmem:[#allocation8 + $0x68] sm:$0xff]  ;;  %v338_v44 = vld [vmem:[#allocation8 + $0x60] sm:$0xff] }
  0x41   :  { %510 = vmatprep.subr.mxu1 %v726_v0  ;;  %535 = vmatprep.subr.mxu0 %v726_v0  ;;  %v337_v45 = vld [vmem:[#allocation8 + $0x58] sm:$0xff]  ;;  %v336_v46 = vld [vmem:[#allocation8 + $0x50] sm:$0xff]  ;;  %v335_v47 = vld [vmem:[#allocation8 + $0x48] sm:$0xff] }
  0x42   :  { %511 = vmatpush3.msra.mxu1 %v160_v12  ;;  %536 = vmatpush3.msra.mxu0 %v253_v23  ;;  %v334_v48 = vld [vmem:[#allocation8 + $0x40] sm:$0xff]  ;;  %v333_v49 = vld [vmem:[#allocation8 + $0x38] sm:$0xff]  ;;  %v332_v50 = vld [vmem:[#allocation8 + $0x30] sm:$0xff] }
  0x43   :  { %512 = vmatprep.subr.mxu1 %v726_v0  ;;  %537 = vmatprep.subr.mxu0 %v726_v0  ;;  %v331_v51 = vld [vmem:[#allocation8 + $0x28] sm:$0xff]  ;;  %v330_v52 = vld [vmem:[#allocation8 + $0x20] sm:$0xff]  ;;  %v329_v53 = vld [vmem:[#allocation8 + $0x18] sm:$0xff] }
  0x44   :  { %513 = vmatpush3.msra.mxu1 %v159_v13  ;;  %538 = vmatpush3.msra.mxu0 %v252_v24  ;;  %v328_v54 = vld [vmem:[#allocation8 + $0x10] sm:$0xff]  ;;  %v327_v58 = vld [vmem:[#allocation8 + $0x8] sm:$0xff]  ;;  %v326_v59 = vld [vmem:[#allocation8] sm:$0xff] }
  0x45   :  { %514 = vmatprep.subr.mxu1 %v726_v0  ;;  %539 = vmatprep.subr.mxu0 %v726_v0 }
  0x46   :  { %515 = vmatpush3.msra.mxu1 %v158_v14  ;;  %540 = vmatpush3.msra.mxu0 %v251_v25 }
  0x47   :  { %516 = vmatprep.subr.mxu1 %v726_v0  ;;  %541 = vmatprep.subr.mxu0 %v726_v0 }
  0x48   :  { %517 = vmatpush3.msra.mxu1 %v157_v15  ;;  %542 = vmatpush3.msra.mxu0 %v250_v26 }
  0x49   :  { %518 = vmatprep.subr.mxu1 %v726_v0  ;;  %543 = vmatprep.subr.mxu0 %v726_v0 }
  0x4a   :  { %519 = vmatpush3.msra.mxu1 %v156_v16  ;;  %544 = vmatpush3.msra.mxu0 %v249_v27 }
  0x4b   :  { %520 = vmatprep.subr.mxu1 %v726_v0  ;;  %545 = vmatprep.subr.mxu0 %v726_v0 }
  0x4c   :  { %521 = vmatpush3.msra.mxu1 %v155_v17  ;;  %546 = vmatpush3.msra.mxu0 %v248_v28 }
  0x4d   :  { %522 = vmatprep.subr.mxu1 %v726_v0  ;;  %547 = vmatprep.subr.mxu0 %v726_v0 }
  0x4e   :  { %523 = vmatpush3.msra.mxu1 %v154_v18  ;;  %548 = vmatpush3.msra.mxu0 %v247_v29 }
  0x4f   :  { %524 = vmatprep.subr.mxu1 %v726_v0  ;;  %549 = vmatprep.subr.mxu0 %v726_v0 }
  0x50   :  { %525 = vmatpush3.msra.mxu1 %v153_v19  ;;  %550 = vmatpush3.msra.mxu0 %v246_v30 }
  0x51   :  { %526 = vmatprep.subr.mxu1 %v726_v0  ;;  %551 = vmatprep.subr.mxu0 %v726_v0 }
  0x52   :  { %527 = vmatpush3.msra.mxu1 %v152_v20  ;;  %552 = vmatpush3.msra.mxu0 %v245_v31 }
  0x53   :  { %528 = vmatprep.subr.mxu1 %v726_v0  ;;  %553 = vmatprep.subr.mxu0 %v726_v0 }
  0x54   :  { %529 = vmatpush3.msra.mxu1 %v151_v21  ;;  %554 = vmatpush3.msra.mxu0 %v244_v32 }
  0x55   :  { %568 = vmatprep.subr.mxu1 %v726_v0  ;;  %555 = vmatprep.subr.mxu0 %v726_v0 }
  0x56   :  { %556 = vmatpush3.msra.mxu0 %v243_v33 }
  0x57   :  { %557 = vmatprep.subr.mxu0 %v726_v0 }
  0x58   :  { %558 = vmatpush3.msra.mxu0 %v242_v34 }
  0x59   :  { %559 = vmatprep.subr.mxu0 %v726_v0 }
  0x5a   :  { %560 = vmatpush3.msra.mxu0 %v241_v35 }
  0x5b   :  { %561 = vmatprep.subr.mxu0 %v726_v0 }
  0x5c   :  { %562 = vmatpush3.msra.mxu0 %v240_v39 }
  0x5d   :  { %563 = vmatprep.subr.mxu0 %v726_v0 }
  0x5e   :  { %564 = vmatpush3.msra.mxu0 %v239_v40 }
  0xfd   :  { %v146_v36 = vpop.f32.mrf.mxu0 }
  0xfe   :  { %v150_v37 = vmax.f32 %v146_v36, 0.0 }
  0xff   :  { %v497_v38 = vpop.f32.mrf.mxu0 }
 0x100   :  { %531 = vmatmul.mubr.f32.vlgmr.msra.gmra.mxu1 %v150_v37 }
 0x101   :  { %600 = vmatprep.mubr.msk.f32.mxu1 %vm727_vm0, %v726_v0  ;;  %569 = vmatpush3.msra.mxu1 %v341_v41 }
 0x102   :  { %570 = vmatprep.subr.mxu1 %v726_v0 }
 0x103   :  { %571 = vmatpush3.msra.mxu1 %v340_v42 }
 0x104   :  { %572 = vmatprep.subr.mxu1 %v726_v0 }
 0x105   :  { %573 = vmatpush3.msra.mxu1 %v339_v43 }
 0x106   :  { %574 = vmatprep.subr.mxu1 %v726_v0 }
 0x107   :  { %575 = vmatpush3.msra.mxu1 %v338_v44 }
 0x108   :  { %576 = vmatprep.subr.mxu1 %v726_v0 }
 0x109   :  { %577 = vmatpush3.msra.mxu1 %v337_v45 }
 0x10a   :  { %578 = vmatprep.subr.mxu1 %v726_v0 }
 0x10b   :  { %579 = vmatpush3.msra.mxu1 %v336_v46 }
 0x10c   :  { %580 = vmatprep.subr.mxu1 %v726_v0 }
 0x10d   :  { %581 = vmatpush3.msra.mxu1 %v335_v47 }
 0x10e   :  { %582 = vmatprep.subr.mxu1 %v726_v0 }
 0x10f   :  { %583 = vmatpush3.msra.mxu1 %v334_v48 }
 0x110   :  { %584 = vmatprep.subr.mxu1 %v726_v0 }
 0x111   :  { %585 = vmatpush3.msra.mxu1 %v333_v49 }
 0x112   :  { %586 = vmatprep.subr.mxu1 %v726_v0 }
 0x113   :  { %587 = vmatpush3.msra.mxu1 %v332_v50 }
 0x114   :  { %588 = vmatprep.subr.mxu1 %v726_v0 }
 0x115   :  { %589 = vmatpush3.msra.mxu1 %v331_v51 }
 0x116   :  { %590 = vmatprep.subr.mxu1 %v726_v0 }
 0x117   :  { %591 = vmatpush3.msra.mxu1 %v330_v52 }
 0x118   :  { %592 = vmatprep.subr.mxu1 %v726_v0 }
 0x119   :  { %593 = vmatpush3.msra.mxu1 %v329_v53 }
 0x11a   :  { %594 = vmatprep.subr.mxu1 %v726_v0 }
 0x11b   :  { %595 = vmatpush3.msra.mxu1 %v328_v54 }
 0x11c   :  { %596 = vmatprep.subr.mxu1 %v726_v0 }
 0x11d   :  { %597 = vmatpush3.msra.mxu1 %v327_v58 }
 0x11e   :  { %598 = vmatprep.subr.mxu1 %v726_v0 }
 0x11f   :  { %599 = vmatpush3.msra.mxu1 %v326_v59 }
 0x1c0   :  { %v233_v55 = vpop.f32.mrf.mxu1 }
 0x1c1   :  { %v237_v56 = vmax.f32 %v233_v55, 0.0 }
 0x1c2   :  { %v532_v57 = vpop.f32.mrf.mxu1 }
 0x1c3   :  { %566 = vmatmul.mubr.f32.vlgmr.msra.gmra.mxu0 %v237_v56 }
 0x283   :  { %v321_v60 = vpop.f32.mrf.mxu0 }
 0x284   :  { %v325_v61 = vmax.f32 %v321_v60, 0.0 }
 0x285   :  { %v567_v62 = vpop.f32.mrf.mxu0 }
 0x286   :  { %601 = vmatmul.mubr.f32.vlgmr.msra.gmra.mxu1 %v325_v61 }
 0x346   :  { %v408_v63 = vpop.f32.mrf.mxu1 }
 0x347   :  { %412 = vst [vmem:[#allocation10] sm:$0xff] %v408_v63 }
 0x348   :  { %v602_v1 = vpop.f32.mrf.mxu1 }
 0x349   :  { %703 = shalt.err (!%p700_p10)
}
 0x34a   :  { %422 = dma.vmem_to_hbm [thread:$0]  %s420_s3, 128, %s842_s4, [#allocation4]  }
 0x34b   :  { %718 = dma.done.wait [#allocation4], 128  }
 0x34c   :  { %719 = vsyncadd [#allocation4], 4294967168 }
 0x34d   :  { %426 = vsyncpa [#allocation3], 1 }
 0x34e   :  { %427 = vsyncpa [#allocation6], 1 }
 0x34f   :  { %428 = vsyncpa [#allocation9], 1 }
 0x350   :  { %429 = vsyncpa [#allocation4], 1 }

</bundles_post_ra>
